<compile_context>
chip_gen: v7x
topology: tpu7x:2x2x1
jax: 0.10.0
libtpu: 0.0.40
codegen_flags: <defaults>
</compile_context>

<pallas_src>
import jax
import jax.numpy as jnp
from jax.experimental import pallas as pl
from jax.experimental.pallas import tpu as pltpu


def _round_up(v: int, m: int) -> int:
    return ((v + m - 1) // m) * m


def _mlp_kernel(xt_ref, w1_ref, b1_ref, w2_ref, b2_ref, ot_ref):
    # xt_ref: (obs, TB)      bf16   -- batch tile, batch on lanes
    # w1_ref: (hidden, obs)  bf16   -- resident (PyTorch layout)
    # b1_ref: (hidden, 1)    f32    -- resident
    # w2_ref: (n_act, hidden) bf16  -- resident (PyTorch layout)
    # b2_ref: (n_act, 1)     f32    -- resident
    # ot_ref: (n_act, TB)    f32    -- lane-dense output tile
    h = jnp.dot(w1_ref[...], xt_ref[...], preferred_element_type=jnp.float32)
    h = jnp.maximum(h + b1_ref[...], 0.0)          # bias + ReLU in f32 (VPU)
    h = h.astype(jnp.bfloat16)                     # back to bf16 for the MXU
    out = jnp.dot(w2_ref[...], h, preferred_element_type=jnp.float32)
    ot_ref[...] = (out + b2_ref[...]).astype(ot_ref.dtype)


def net_forward(x, w1, b1, w2, b2, *, tb_target: int = 16384):
    """Forward pass of Net (Linear -> ReLU -> Linear) as a Pallas TPU kernel.

    x : (B, obs)            float32
    w1: (hidden, obs)       float32   (PyTorch nn.Linear weight layout)
    b1: (hidden,)           float32
    w2: (n_actions, hidden) float32
    b2: (n_actions,)        float32
    returns (B, n_actions)  float32
    """
    B, obs = x.shape
    hidden = w1.shape[0]
    n_act = w2.shape[0]

    # Batch tiling: TB is a multiple of 128 (lane-dense blocks); pad B up.
    n_tiles = max(1, -(-B // tb_target))
    TB = _round_up(-(-B // n_tiles), 128)
    B_pad = n_tiles * TB

    # Host-side prep: batch onto the lane axis, bf16 operands (fused by XLA),
    # zero-pad the batch (zeros flow through harmlessly and are sliced off).
    x_t = jnp.pad(x.T.astype(jnp.bfloat16), ((0, 0), (0, B_pad - B)))
    w1b = w1.astype(jnp.bfloat16)
    w2b = w2.astype(jnp.bfloat16)
    b1c = b1.reshape(hidden, 1).astype(jnp.float32)
    b2c = b2.reshape(n_act, 1).astype(jnp.float32)

    # Constant block index -> DMA'd once, stays resident across the grid.
    resident = lambda shape: pl.BlockSpec(shape, lambda i: (0, 0))

    out_t = pl.pallas_call(
        _mlp_kernel,
        out_shape=jax.ShapeDtypeStruct((n_act, B_pad), jnp.float32),
        grid=(n_tiles,),
        in_specs=[
            pl.BlockSpec((obs, TB), lambda i: (0, i)),   # x tile streams over batch
            resident((hidden, obs)),
            resident((hidden, 1)),
            resident((n_act, hidden)),
            resident((n_act, 1)),
        ],
        out_specs=pl.BlockSpec((n_act, TB), lambda i: (0, i)),
        compiler_params=pltpu.CompilerParams(
            dimension_semantics=("parallel",),
        ),
    )(x_t, w1b, b1c, w2b, b2c)

    return out_t[:, :B].T


if __name__ == "__main__":
    # Small shapes consistent with Net(obs_size, hidden_size, n_actions).
    batch = 8
    obs_size = 16
    hidden_size = 32
    n_actions = 8

    key = jax.random.PRNGKey(0)
    kx, kw1, kb1, kw2, kb2 = jax.random.split(key, 5)

    x = jax.random.normal(kx, (batch, obs_size), dtype=jnp.float32)

    # PyTorch-default-style uniform init, in native nn.Linear layout.
    lim1 = obs_size ** -0.5
    lim2 = hidden_size ** -0.5
    w1 = jax.random.uniform(kw1, (hidden_size, obs_size), jnp.float32, -lim1, lim1)
    b1 = jax.random.uniform(kb1, (hidden_size,), jnp.float32, -lim1, lim1)
    w2 = jax.random.uniform(kw2, (n_actions, hidden_size), jnp.float32, -lim2, lim2)
    b2 = jax.random.uniform(kb2, (n_actions,), jnp.float32, -lim2, lim2)

    out = jax.block_until_ready(net_forward(x, w1, b1, w2, b2))

    # Tight check vs a reference using the same bf16-operand / f32-accumulate math.
    xb = x.astype(jnp.bfloat16)
    w1bf = w1.astype(jnp.bfloat16)
    w2bf = w2.astype(jnp.bfloat16)
    h_ref = jnp.maximum(
        jnp.dot(xb, w1bf.T, preferred_element_type=jnp.float32) + b1, 0.0)
    ref_bf16 = jnp.dot(h_ref.astype(jnp.bfloat16), w2bf.T,
                       preferred_element_type=jnp.float32) + b2
    # Loose sanity check vs the pure-f32 reference (bf16 operand rounding).
    ref_f32 = jnp.maximum(x @ w1.T + b1, 0.0) @ w2.T + b2

    assert out.shape == (batch, n_actions)
    assert jnp.allclose(out, ref_bf16, atol=2e-3, rtol=2e-3), "mismatch vs bf16 reference"
    assert jnp.allclose(out, ref_f32, atol=5e-2, rtol=5e-2), "mismatch vs f32 reference"

    print("KERNEL_OK")
</pallas_src>

<mosaic_0001>
module attributes {stable_mosaic.version = 11 : i64} {
  func.func @_mlp_kernel(%arg0: i32, %arg1: memref<16x128xbf16, #tpu.memory_space<vmem>>, %arg2: memref<32x16xbf16, #tpu.memory_space<vmem>>, %arg3: memref<32x1xf32, #tpu.memory_space<vmem>>, %arg4: memref<8x32xbf16, #tpu.memory_space<vmem>>, %arg5: memref<8x1xf32, #tpu.memory_space<vmem>>, %arg6: memref<8x128xf32, #tpu.memory_space<vmem>>) attributes {dimension_semantics = [#tpu.dimension_semantics<parallel>], iteration_bounds = array<i64: 1>, scalar_prefetch = 0 : i64, scratch_operands = 0 : i64, tpu.core_type = #tpu.core_type<tc>, window_params = [{transform_indices = @transform_0, window_bounds = array<i64: 16, 128>}, {pipeline_mode = #tpu.pipeline_mode<synchronous>, transform_indices = @transform_1, window_bounds = array<i64: 32, 16>}, {pipeline_mode = #tpu.pipeline_mode<synchronous>, transform_indices = @transform_2, window_bounds = array<i64: 32, 1>}, {pipeline_mode = #tpu.pipeline_mode<synchronous>, transform_indices = @transform_3, window_bounds = array<i64: 8, 32>}, {pipeline_mode = #tpu.pipeline_mode<synchronous>, transform_indices = @transform_4, window_bounds = array<i64: 8, 1>}, {transform_indices = @transform_5, window_bounds = array<i64: 8, 128>}]} {
    %c0 = arith.constant 0 : index
    %c0_0 = arith.constant 0 : index
    %0 = vector.load %arg2[%c0, %c0_0] : memref<32x16xbf16, #tpu.memory_space<vmem>>, vector<32x16xbf16>
    %c0_1 = arith.constant 0 : index
    %c0_2 = arith.constant 0 : index
    %1 = vector.load %arg1[%c0_1, %c0_2] : memref<16x128xbf16, #tpu.memory_space<vmem>>, vector<16x128xbf16>
    %cst = arith.constant dense<0.000000e+00> : vector<32x128xf32>
    %2 = tpu.matmul %0, %1, %cst {dimension_numbers = #tpu.dot_dimension_numbers<[1], [0], [0], [1], [0, 0, 1, 1], [], []>} : vector<32x16xbf16>, vector<16x128xbf16>, vector<32x128xf32> -> vector<32x128xf32>
    %c0_3 = arith.constant 0 : index
    %c0_4 = arith.constant 0 : index
    %3 = vector.load %arg3[%c0_3, %c0_4] : memref<32x1xf32, #tpu.memory_space<vmem>>, vector<32x1xf32>
    %4 = vector.broadcast %3 : vector<32x1xf32> to vector<32x128xf32>
    %5 = arith.addf %2, %4 : vector<32x128xf32>
    %cst_5 = arith.constant 0.000000e+00 : f32
    %6 = vector.broadcast %cst_5 : f32 to vector<32x128xf32>
    %7 = arith.maximumf %5, %6 : vector<32x128xf32>
    %8 = arith.truncf %7 : vector<32x128xf32> to vector<32x128xbf16>
    %c0_6 = arith.constant 0 : index
    %c0_7 = arith.constant 0 : index
    %9 = vector.load %arg4[%c0_6, %c0_7] : memref<8x32xbf16, #tpu.memory_space<vmem>>, vector<8x32xbf16>
    %cst_8 = arith.constant dense<0.000000e+00> : vector<8x128xf32>
    %10 = tpu.matmul %9, %8, %cst_8 {dimension_numbers = #tpu.dot_dimension_numbers<[1], [0], [0], [1], [0, 0, 1, 1], [], []>} : vector<8x32xbf16>, vector<32x128xbf16>, vector<8x128xf32> -> vector<8x128xf32>
    %c0_9 = arith.constant 0 : index
    %c0_10 = arith.constant 0 : index
    %11 = vector.load %arg5[%c0_9, %c0_10] : memref<8x1xf32, #tpu.memory_space<vmem>>, vector<8x1xf32>
    %12 = vector.broadcast %11 : vector<8x1xf32> to vector<8x128xf32>
    %13 = arith.addf %10, %12 : vector<8x128xf32>
    %c0_11 = arith.constant 0 : index
    %c0_12 = arith.constant 0 : index
    %14 = vector.load %arg6[%c0_11, %c0_12] : memref<8x128xf32, #tpu.memory_space<vmem>>, vector<8x128xf32>
    tpu.vector_store %arg6[%c0_11, %c0_12], %13 {strides = array<i32>} : memref<8x128xf32, #tpu.memory_space<vmem>>, vector<8x128xf32>,
    return
  }
  func.func @transform_0(%arg0: i32) -> (i32, i32) {
    %c0_i32 = arith.constant 0 : i32
    %c0_i32_0 = arith.constant 0 : i32
    return %c0_i32, %arg0 : i32, i32
  }
  func.func @transform_1(%arg0: i32) -> (i32, i32) {
    %c0_i32 = arith.constant 0 : i32
    %c0_i32_0 = arith.constant 0 : i32
    %c0_i32_1 = arith.constant 0 : i32
    return %c0_i32, %c0_i32_0 : i32, i32
  }
  func.func @transform_2(%arg0: i32) -> (i32, i32) {
    %c0_i32 = arith.constant 0 : i32
    %c0_i32_0 = arith.constant 0 : i32
    %c0_i32_1 = arith.constant 0 : i32
    return %c0_i32, %c0_i32_0 : i32, i32
  }
  func.func @transform_3(%arg0: i32) -> (i32, i32) {
    %c0_i32 = arith.constant 0 : i32
    %c0_i32_0 = arith.constant 0 : i32
    %c0_i32_1 = arith.constant 0 : i32
    return %c0_i32, %c0_i32_0 : i32, i32
  }
  func.func @transform_4(%arg0: i32) -> (i32, i32) {
    %c0_i32 = arith.constant 0 : i32
    %c0_i32_0 = arith.constant 0 : i32
    %c0_i32_1 = arith.constant 0 : i32
    return %c0_i32, %c0_i32_0 : i32, i32
  }
  func.func @transform_5(%arg0: i32) -> (i32, i32) {
    %c0_i32 = arith.constant 0 : i32
    %c0_i32_0 = arith.constant 0 : i32
    return %c0_i32, %arg0 : i32, i32
  }
}

</mosaic_0001>

<bundles_post_ra>
// kernel: tpu_custom_call.1
= control target key start
LH: loop header
LB: loop body
LE: loop exit
PB: predicated region body
PF: predicated region fallthrough
CT: control target
= control target key end

     0   :  { %vm68_vm0 = vcmask 130048   ;;  %v255_v3 = vmov 0   ;;  %s328_s0 = inlined_call_operand.vmem [shape: bf16[16,128], index: 0, kind: input, shape index: {}]   ;;  %s329_s1 = inlined_call_operand.vmem [shape: bf16[32,16], index: 1, kind: input, shape index: {}]   ;;  %s330_s2 = inlined_call_operand.vmem [shape: f32[32,1], index: 2, kind: input, shape index: {}]   ;;  %s331_s3 = inlined_call_operand.vmem [shape: bf16[8,32], index: 3, kind: input, shape index: {}]   ;;  %s332_s4 = inlined_call_operand.vmem [shape: f32[8,1], index: 4, kind: input, shape index: {}]   ;;  %s333_s5 = inlined_call_operand.hbm [shape: f32[8,128], index: 5, kind: output, shape index: {}]  }
   0x1   :  { %v228_v0 = vld [vmem:[%s328_s0] sm:$0xff]   ;;  %v230_v2 = vld [vmem:[%s329_s1 + $0x8] sm:$0xff]   ;;  %226 = vset.pattern.permute.xlu0 %v255_v3  ;;  %v30_v5 = vld [vmem:[%s330_s2 + $0x10] sm:$0xff]  ;;  %227 = vset.pattern.permute.xlu1 %v255_v3 }
   0x2   :  { %v229_v1 = vld [vmem:[%s329_s1] sm:$0xff]   ;;  %208 = vmatprep.subr.bf16.mxu0 %v228_v0 }
   0x3   :  { %209 = vmatpush3.bf16.msra.mxu0 %v228_v0  ;;  %210 = vmatprep.mubr.msk.bf16.mxu0 %vm68_vm0, %v229_v1  ;;  %v28_v4 = vld [vmem:[%s330_s2] sm:$0xff] }
   0x4   :  { %34 = vperm.xlu0 %226, %v28_v4  }
   0x5   :  { %10 = vsyncpa [#allocation3], 0  ;;  %v29_v6 = vld [vmem:[%s330_s2 + $0x8] sm:$0xff]  ;;  %44 = vperm.xlu1 %227, %v30_v5   ;;  %v31_v7 = vld [vmem:[%s330_s2 + $0x18] sm:$0xff]  ;;  %v256_v9 = vmov 0.0   ;;  %vm257_vm1 = vmmov 0  }
   0x6   :  { %211 = vmatmul.mubr.msk.bf16.vlgmr.msra.gmra.mrb[0].mxu0 %vm68_vm0, %v230_v2  ;;  %v131_v8 = vld [vmem:[%s332_s4] sm:$0xff]  ;;  %214 = vmatprep.subr.bf16.mxu1 %v256_v9  ;;  %vm137_vm2 = vcmask 261120   ;;  %s258_s7 = smov [#allocation2]  }
   0x7   :  { %218 = vmatprep.mubr.msk.bf16.mxu1 %vm257_vm1, %v256_v9  ;;  %v130_v28 = vld [vmem:[%s331_s3] sm:$0xf]  ;;  %s188_s8 = sshll.u32 %s258_s7, 4  ;;  %s189_s8 = int_to_ptr.vmem [resolvable:$true] %s188_s8 }
   0x8   :  { %39 = vperm.xlu0 %226, %v29_v6   ;;  %s231_s9 = scalar_lea.vmem %s189_s8, 128  ;;  %p236_p1 = scmp.lt.s32.totalorder %s189_s8, %s189_s8 }
   0x9   :  { %49 = vperm.xlu1 %227, %v31_v7   ;;  %p232_p0 = scmp.ne.s32.totalorder %s189_s8, %s231_s9  ;;  %p237_p2 = scmp.lt.s32.totalorder %s231_s9, %s231_s9 }
   0xb   :  { %p238_p3 = por %p237_p2, %p236_p1 }
   0xc   :  { %134 = vperm.xlu0 %226, %v131_v8  }
   0xd   :  { %p239_p4 = pnand %p238_p3, %p232_p0 }
  0x83   :  { %v35_v11 = vpop.permute.xlu0 %34 }
  0x84   :  { %v45_v10 = vpop.permute.xlu1 %44 }
  0x87   :  { %v40_v18 = vpop.permute.xlu0 %39 }
  0x88   :  { %v50_v13 = vpop.permute.xlu1 %49 }
  0x8b   :  { %v135_v29 = vpop.permute.xlu0 %134 }
  0xd9   :  { %v212_v12 = vpop.f32.mrb[0].mxu0 }
  0xda   :  { %v118_v14 = vadd.f32 %v212_v12, %v45_v10  ;;  %v109_v15 = vpop.f32.mrb[1].mxu0 }
  0xdb   :  { %v110_v16 = vadd.f32 %v109_v15, %v35_v11  ;;  %v213_v17 = vpop.f32.mrb[2].mxu0 }
  0xdc   :  { %v121_v19 = vadd.f32 %v213_v17, %v50_v13  ;;  %v112_v20 = vpop.f32.mrb[3].mxu0  ;;  %v126_v22 = vmax.f32 %v118_v14, 0.0 }
  0xdd   :  { %v113_v21 = vadd.f32 %v112_v20, %v40_v18  ;;  %v124_v24 = vmax.f32 %v110_v16, 0.0 }
  0xde   :  { %v127_v23 = vmax.f32 %v121_v19, 0.0 }
  0xdf   :  { %v125_v25 = vmax.f32 %v113_v21, 0.0 }
  0xe0   :  { %v129_v26 = vpack.c.bf16 %v127_v23, %v126_v22 }
  0xe1   :  { %v128_v27 = vpack.c.bf16 %v125_v25, %v124_v24 }
  0xe3   :  { %215 = vmatpush3.bf16.msra.mxu1 %v128_v27 }
  0xe4   :  { %216 = vmatprep.subr.bf16.mxu1 %v256_v9 }
  0xe7   :  { %217 = vmatpush3.bf16.msra.mxu1 %v129_v26 }
  0xea   :  { %219 = vmatmul.mubr.msk.bf16.vlgmr.msra.gmra.mrb[0].mxu1 %vm137_vm2, %v130_v28 }
 0x1bd   :  { %v175_v30 = vpop.f32.mrb[0].mxu1 }
 0x1be   :  { %v176_v31 = vadd.f32 %v175_v30, %v135_v29  ;;  %v220_v32 = vpop.f32.mrb[1].mxu1 }
 0x1bf   :  { %v178_v33 = vpop.f32.mrb[2].mxu1 }
 0x1c0   :  { %181 = vst [vmem:[#allocation2] sm:$0xff] %v176_v31  ;;  %v221_v34 = vpop.f32.mrb[3].mxu1 }
 0x1c1   :  { %242 = shalt.err (!%p239_p4)
}
 0x1c2   :  { %s243_s11 = scalar_lea.hbm %s333_s5, 128 }
 0x1c3   :  { %p244_p5 = scmp.ne.s32.totalorder %s333_s5, %s243_s11  ;;  %p247_p6 = scmp.lt.u32.totalorder %s243_s11, %s333_s5 }
 0x1c5   :  { %p249_p7 = pnand %p247_p6, %p244_p5 }
 0x1c7   :  { %252 = shalt.err (!%p249_p7)
}
 0x1c8   :  { %191 = dma.vmem_to_hbm [thread:$0]  %s189_s8, 128, %s333_s5, [#allocation3]  }
 0x1c9   :  { %253 = dma.done.wait [#allocation3], 128  }
 0x1ca   :  { %254 = vsyncadd [#allocation3], 4294967168 }
 0x1cb   :  { %195 = vsyncpa [#allocation3], 1 }

</bundles_post_ra>
